<compile_context>
chip_gen: v7x
topology: tpu7x:2x2x1
jax: 0.10.0
libtpu: 0.0.40
codegen_flags: <defaults>
</compile_context>

<pallas_src>
import jax
import jax.numpy as jnp
from jax.experimental import pallas as pl
from jax.experimental.pallas import tpu as pltpu


def _conv1x1_kernel(w_ref, x_ref, b_ref, o_ref):
    # w_ref: (Cout, Cin)  x_ref: (Cin, TM)  b_ref: (Cout, 1)  o_ref: (Cout, TM)
    acc = jnp.dot(w_ref[...], x_ref[...], preferred_element_type=jnp.float32)
    o_ref[...] = (acc + b_ref[...]).astype(o_ref.dtype)


def _round_up(x, m):
    return ((x + m - 1) // m) * m


def _tm_cap():
    """Per-generation pixel-tile cap (keeps double-buffered x inside scoped VMEM)."""
    try:
        kind = jax.devices()[0].device_kind.lower()
    except Exception:
        return 1024
    if "v6" in kind or "v7" in kind:
        return 2048          # ~15.7 MiB peak, inside the 32 MiB scoped default
    return 1024              # v5e: 16 MiB scoped default -> ~8.3 MiB peak


def conv2d_1x1(x_nchw, weight, bias):
    """1x1 stride-1 conv with bias, matching torch.nn.Conv2d semantics.

    x_nchw : (N, Cin, H, W)  float32
    weight : (Cout, Cin, 1, 1) float32
    bias   : (Cout,) float32
    returns: (N, Cout, H, W) float32
    """
    N, Cin, H, W = x_nchw.shape
    Cout = weight.shape[0]
    M = N * H * W

    # NCHW -> (Cin, M).  For N == 1 this is a pure reshape (no data movement).
    x_mat = jnp.transpose(x_nchw, (1, 0, 2, 3)).reshape(Cin, M)
    w_mat = weight.reshape(Cout, Cin)          # (Cout, Cin) — no .T needed
    b_col = bias.reshape(Cout, 1)              # broadcasts over the lane dim

    LANE = 128
    SMALL_M = 512
    if M <= SMALL_M:
        # Fast path: single block spanning the whole pixel axis.  Block dims
        # equal the full array dims, so no (8,128) padding and no HBM pad.
        TM = M
    else:
        # Tiled path: lane-aligned tile, generation-capped, and capped at
        # ~M/2 so the grid always has >= 2 "parallel" steps (v7x megacore).
        half = _round_up(pl.cdiv(M, 2), LANE)
        TM = max(LANE, min(_tm_cap(), half))

    grid = (pl.cdiv(M, TM),)   # last block may be partial: writes are masked

    out_mat = pl.pallas_call(
        _conv1x1_kernel,
        out_shape=jax.ShapeDtypeStruct((Cout, M), x_nchw.dtype),
        grid_spec=pltpu.PrefetchScalarGridSpec(
            num_scalar_prefetch=0,
            grid=grid,
            in_specs=[
                pl.BlockSpec((Cout, Cin), lambda i: (0, 0)),  # weight: resident
                pl.BlockSpec((Cin, TM), lambda i: (0, i)),    # x: pixel tile
                pl.BlockSpec((Cout, 1), lambda i: (0, 0)),    # bias: resident
            ],
            out_specs=pl.BlockSpec((Cout, TM), lambda i: (0, i)),
        ),
        compiler_params=pltpu.CompilerParams(
            dimension_semantics=("parallel",)),
        cost_estimate=pl.CostEstimate(
            flops=2 * M * Cin * Cout,
            transcendentals=0,
            bytes_accessed=4 * (M * Cin + Cin * Cout + M * Cout + Cout)),
    )(w_mat, x_mat, b_col)

    # (Cout, M) -> (N, Cout, H, W).  For N == 1 this is a pure reshape.
    return jnp.transpose(out_mat.reshape(Cout, N, H, W), (1, 0, 2, 3))


def _reference(x_nchw, weight, bias):
    Cout, Cin = weight.shape[0], weight.shape[1]
    return (jnp.einsum("nchw,oc->nohw", x_nchw, weight.reshape(Cout, Cin))
            + bias.reshape(1, Cout, 1, 1))


if __name__ == "__main__":
    key = jax.random.PRNGKey(0)
    k_x, k_w, k_b, k_x2, k_x3 = jax.random.split(key, 5)

    # Shapes implied by the module: Conv2d(960, 40, 1x1) on x of (1, 960, 1, 1).
    N, Cin, Cout, H, W = 1, 960, 40, 1, 1

    x = jax.random.normal(k_x, (N, Cin, H, W), dtype=jnp.float32)
    fan_in = Cin  # * 1 * 1 kernel
    bound = 1.0 / (fan_in ** 0.5)
    weight = jax.random.uniform(k_w, (Cout, Cin, 1, 1), minval=-bound,
                                maxval=bound, dtype=jnp.float32)
    bias = jax.random.uniform(k_b, (Cout,), minval=-bound, maxval=bound,
                              dtype=jnp.float32)

    # 1) Production shape: M = 1 -> fast path (single full-dim block, no pad).
    out = jax.block_until_ready(conv2d_1x1(x, weight, bias))
    ref = _reference(x, weight, bias)
    assert out.shape == (N, Cout, H, W)
    assert jnp.allclose(out, ref, atol=1e-4, rtol=1e-4)

    # 2) Fast path with a non-128-multiple pixel count (M = 300, single block).
    H2, W2 = 20, 15
    x2 = jax.random.normal(k_x2, (1, Cin, H2, W2), dtype=jnp.float32)
    out2 = jax.block_until_ready(conv2d_1x1(x2, weight, bias))
    ref2 = _reference(x2, weight, bias)
    assert out2.shape == (1, Cout, H2, W2)
    assert jnp.allclose(out2, ref2, atol=1e-4, rtol=1e-4)

    # 3) Tiled path with a ragged tail (M = 576 -> TM = 384, grid = 2, no pad).
    H3, W3 = 24, 24
    x3 = jax.random.normal(k_x3, (1, Cin, H3, W3), dtype=jnp.float32)
    out3 = jax.block_until_ready(conv2d_1x1(x3, weight, bias))
    ref3 = _reference(x3, weight, bias)
    assert out3.shape == (1, Cout, H3, W3)
    assert jnp.allclose(out3, ref3, atol=1e-4, rtol=1e-4)

    print("KERNEL_OK")
</pallas_src>

<mosaic_0001>
module attributes {stable_mosaic.version = 11 : i64} {
  func.func @_conv1x1_kernel(%arg0: i32, %arg1: memref<40x960xf32, #tpu.memory_space<vmem>>, %arg2: memref<960x1xf32, #tpu.memory_space<vmem>>, %arg3: memref<40x1xf32, #tpu.memory_space<vmem>>, %arg4: memref<40x1xf32, #tpu.memory_space<vmem>>) attributes {dimension_semantics = [#tpu.dimension_semantics<parallel>], iteration_bounds = array<i64: 1>, scalar_prefetch = 0 : i64, scratch_operands = 0 : i64, tpu.core_type = #tpu.core_type<tc>, window_params = [{pipeline_mode = #tpu.pipeline_mode<synchronous>, transform_indices = @transform_0, window_bounds = array<i64: 40, 960>}, {transform_indices = @transform_1, window_bounds = array<i64: 960, 1>}, {pipeline_mode = #tpu.pipeline_mode<synchronous>, transform_indices = @transform_2, window_bounds = array<i64: 40, 1>}, {transform_indices = @transform_3, window_bounds = array<i64: 40, 1>}]} {
    %c0 = arith.constant 0 : index
    %c0_0 = arith.constant 0 : index
    %0 = vector.load %arg1[%c0, %c0_0] : memref<40x960xf32, #tpu.memory_space<vmem>>, vector<40x960xf32>
    %c0_1 = arith.constant 0 : index
    %c0_2 = arith.constant 0 : index
    %1 = vector.load %arg2[%c0_1, %c0_2] : memref<960x1xf32, #tpu.memory_space<vmem>>, vector<960x1xf32>
    %cst = arith.constant dense<0.000000e+00> : vector<40x1xf32>
    %2 = tpu.matmul %0, %1, %cst {dimension_numbers = #tpu.dot_dimension_numbers<[1], [0], [0], [1], [0, 0, 1, 1], [], []>} : vector<40x960xf32>, vector<960x1xf32>, vector<40x1xf32> -> vector<40x1xf32>
    %c0_3 = arith.constant 0 : index
    %c0_4 = arith.constant 0 : index
    %3 = vector.load %arg3[%c0_3, %c0_4] : memref<40x1xf32, #tpu.memory_space<vmem>>, vector<40x1xf32>
    %4 = arith.addf %2, %3 : vector<40x1xf32>
    %c0_5 = arith.constant 0 : index
    %c0_6 = arith.constant 0 : index
    %5 = vector.load %arg4[%c0_5, %c0_6] : memref<40x1xf32, #tpu.memory_space<vmem>>, vector<40x1xf32>
    tpu.vector_store %arg4[%c0_5, %c0_6], %4 {strides = array<i32>} : memref<40x1xf32, #tpu.memory_space<vmem>>, vector<40x1xf32>,
    return
  }
  func.func @transform_0(%arg0: i32) -> (i32, i32) {
    %c0_i32 = arith.constant 0 : i32
    %c0_i32_0 = arith.constant 0 : i32
    %c0_i32_1 = arith.constant 0 : i32
    return %c0_i32, %c0_i32_0 : i32, i32
  }
  func.func @transform_1(%arg0: i32) -> (i32, i32) {
    %c0_i32 = arith.constant 0 : i32
    %c0_i32_0 = arith.constant 0 : i32
    return %c0_i32, %arg0 : i32, i32
  }
  func.func @transform_2(%arg0: i32) -> (i32, i32) {
    %c0_i32 = arith.constant 0 : i32
    %c0_i32_0 = arith.constant 0 : i32
    %c0_i32_1 = arith.constant 0 : i32
    return %c0_i32, %c0_i32_0 : i32, i32
  }
  func.func @transform_3(%arg0: i32) -> (i32, i32) {
    %c0_i32 = arith.constant 0 : i32
    %c0_i32_0 = arith.constant 0 : i32
    return %c0_i32, %arg0 : i32, i32
  }
}

</mosaic_0001>

<bundles_post_ra>
// kernel: tpu_custom_call.1
= control target key start
LH: loop header
LB: loop body
LE: loop exit
PB: predicated region body
PF: predicated region fallthrough
CT: control target
= control target key end

     0   :  { %vm179_vm0 = vcmask 523264   ;;  %vm555_vm1 = vcmask 7168   ;;  %s1397_s1 = inlined_call_operand.vmem [shape: f32[960,1], index: 1, kind: input, shape index: {}]   ;;  %s1398_s0 = inlined_call_operand.vmem [shape: f32[40,960], index: 0, kind: input, shape index: {}]   ;;  %s1399_s2 = inlined_call_operand.vmem [shape: f32[40,1], index: 2, kind: input, shape index: {}]   ;;  %s1400_s3 = inlined_call_operand.vmem [shape: f32[40,1], index: 3, kind: output, shape index: {}]  }
   0x1   :  { %v70_v0 = vld [vmem:[%s1397_s1 + $0x80] sm:$0xff]  ;;  %v71_v1 = vld [vmem:[%s1397_s1 + $0x88] sm:$0xff]  ;;  %v72_v11 = vld [vmem:[%s1397_s1 + $0x90] sm:$0xff] }
   0x2   :  { %v102_v2 = vld [vmem:[%s1397_s1 + $0x180] sm:$0xff]  ;;  %v711_v3 = vpack.c.bf16 %v71_v1, %v70_v0  ;;  %v103_v4 = vld [vmem:[%s1397_s1 + $0x188] sm:$0xff]  ;;  %v73_v13 = vld [vmem:[%s1397_s1 + $0x98] sm:$0xff] }
   0x3   :  { %v54_v5 = vld [vmem:[%s1397_s1] sm:$0xff]  ;;  %v55_v6 = vld [vmem:[%s1397_s1 + $0x8] sm:$0xff]  ;;  %v743_v7 = vpack.c.bf16 %v103_v4, %v102_v2  ;;  %v104_v14 = vld [vmem:[%s1397_s1 + $0x190] sm:$0xff]  ;;  %v715_v16 = vpack.c.bf16 %v73_v13, %v72_v11 }
   0x4   :  { %v713_v8 = vpack.c.bf16 %v55_v6, %v54_v5  ;;  %v86_v9 = vld [vmem:[%s1397_s1 + $0x100] sm:$0xff]  ;;  %v87_v10 = vld [vmem:[%s1397_s1 + $0x108] sm:$0xff]  ;;  %712 = vmatprep.subr.bf16.mxu0 %v711_v3  ;;  %v105_v15 = vld [vmem:[%s1397_s1 + $0x198] sm:$0xff] }
   0x5   :  { %v745_v12 = vpack.c.bf16 %v87_v10, %v86_v9  ;;  %744 = vmatprep.subr.bf16.mxu1 %v743_v7  ;;  %v747_v17 = vpack.c.bf16 %v105_v15, %v104_v14  ;;  %v56_v18 = vld [vmem:[%s1397_s1 + $0x10] sm:$0xff]  ;;  %v57_v19 = vld [vmem:[%s1397_s1 + $0x18] sm:$0xff]  ;;  %v74_v23 = vld [vmem:[%s1397_s1 + $0xa0] sm:$0xff] }
   0x6   :  { %714 = vmatpush3.bf16.msra.mxu0 %v713_v8  ;;  %v88_v20 = vld [vmem:[%s1397_s1 + $0x110] sm:$0xff]  ;;  %v717_v21 = vpack.c.bf16 %v57_v19, %v56_v18  ;;  %v89_v22 = vld [vmem:[%s1397_s1 + $0x118] sm:$0xff]  ;;  %v75_v24 = vld [vmem:[%s1397_s1 + $0xa8] sm:$0xff] }
   0x7   :  { %746 = vmatpush3.bf16.msra.mxu1 %v745_v12  ;;  %716 = vmatprep.subr.bf16.mxu0 %v715_v16  ;;  %v749_v25 = vpack.c.bf16 %v89_v22, %v88_v20  ;;  %v719_v26 = vpack.c.bf16 %v75_v24, %v74_v23  ;;  %v106_v27 = vld [vmem:[%s1397_s1 + $0x1a0] sm:$0xff]  ;;  %v107_v28 = vld [vmem:[%s1397_s1 + $0x1a8] sm:$0xff]  ;;  %v76_v35 = vld [vmem:[%s1397_s1 + $0xb0] sm:$0xff] }
   0x8   :  { %748 = vmatprep.subr.bf16.mxu1 %v747_v17  ;;  %v58_v29 = vld [vmem:[%s1397_s1 + $0x20] sm:$0xff]  ;;  %v751_v30 = vpack.c.bf16 %v107_v28, %v106_v27  ;;  %v59_v31 = vld [vmem:[%s1397_s1 + $0x28] sm:$0xff]  ;;  %v77_v36 = vld [vmem:[%s1397_s1 + $0xb8] sm:$0xff] }
   0x9   :  { %v90_v32 = vld [vmem:[%s1397_s1 + $0x120] sm:$0xff]  ;;  %v91_v33 = vld [vmem:[%s1397_s1 + $0x128] sm:$0xff]  ;;  %v721_v34 = vpack.c.bf16 %v59_v31, %v58_v29  ;;  %v108_v37 = vld [vmem:[%s1397_s1 + $0x1b0] sm:$0xff]  ;;  %v723_v39 = vpack.c.bf16 %v77_v36, %v76_v35 }
   0xa   :  { %718 = vmatpush3.bf16.msra.mxu0 %v717_v21  ;;  %v753_v38 = vpack.c.bf16 %v91_v33, %v90_v32  ;;  %v109_v40 = vld [vmem:[%s1397_s1 + $0x1b8] sm:$0xff]  ;;  %v60_v41 = vld [vmem:[%s1397_s1 + $0x30] sm:$0xff]  ;;  %v78_v46 = vld [vmem:[%s1397_s1 + $0xc0] sm:$0xff] }
   0xb   :  { %750 = vmatpush3.bf16.msra.mxu1 %v749_v25  ;;  %720 = vmatprep.subr.bf16.mxu0 %v719_v26  ;;  %v61_v42 = vld [vmem:[%s1397_s1 + $0x38] sm:$0xff]  ;;  %v755_v43 = vpack.c.bf16 %v109_v40, %v108_v37  ;;  %v92_v44 = vld [vmem:[%s1397_s1 + $0x130] sm:$0xff]  ;;  %v79_v47 = vld [vmem:[%s1397_s1 + $0xc8] sm:$0xff] }
   0xc   :  { %752 = vmatprep.subr.bf16.mxu1 %v751_v30  ;;  %v93_v45 = vld [vmem:[%s1397_s1 + $0x138] sm:$0xff]  ;;  %v110_v48 = vld [vmem:[%s1397_s1 + $0x1c0] sm:$0xff]  ;;  %v111_v49 = vld [vmem:[%s1397_s1 + $0x1c8] sm:$0xff]  ;;  %v725_v50 = vpack.c.bf16 %v61_v42, %v60_v41  ;;  %v727_v52 = vpack.c.bf16 %v79_v47, %v78_v46 }
   0xd   :  { %v757_v51 = vpack.c.bf16 %v93_v45, %v92_v44  ;;  %v62_v53 = vld [vmem:[%s1397_s1 + $0x40] sm:$0xff]  ;;  %v63_v54 = vld [vmem:[%s1397_s1 + $0x48] sm:$0xff]  ;;  %v759_v56 = vpack.c.bf16 %v111_v49, %v110_v48  ;;  %v80_v58 = vld [vmem:[%s1397_s1 + $0xd0] sm:$0xff] }
   0xe   :  { %722 = vmatpush3.bf16.msra.mxu0 %v721_v34  ;;  %v94_v55 = vld [vmem:[%s1397_s1 + $0x140] sm:$0xff]  ;;  %v95_v57 = vld [vmem:[%s1397_s1 + $0x148] sm:$0xff]  ;;  %v81_v59 = vld [vmem:[%s1397_s1 + $0xd8] sm:$0xff]  ;;  %v729_v62 = vpack.c.bf16 %v63_v54, %v62_v53 }
   0xf   :  { %754 = vmatpush3.bf16.msra.mxu1 %v753_v38  ;;  %724 = vmatprep.subr.bf16.mxu0 %v723_v39  ;;  %v112_v60 = vld [vmem:[%s1397_s1 + $0x1d0] sm:$0xff]  ;;  %v113_v61 = vld [vmem:[%s1397_s1 + $0x1d8] sm:$0xff]  ;;  %v761_v63 = vpack.c.bf16 %v95_v57, %v94_v55  ;;  %v731_v0 = vpack.c.bf16 %v81_v59, %v80_v58  ;;  %v82_v6 = vld [vmem:[%s1397_s1 + $0xe0] sm:$0xff] }
  0x10   :  { %756 = vmatprep.subr.bf16.mxu1 %v755_v43  ;;  %v64_v1 = vld [vmem:[%s1397_s1 + $0x50] sm:$0xff]  ;;  %v65_v2 = vld [vmem:[%s1397_s1 + $0x58] sm:$0xff]  ;;  %v763_v4 = vpack.c.bf16 %v113_v61, %v112_v60  ;;  %v83_v7 = vld [vmem:[%s1397_s1 + $0xe8] sm:$0xff] }
  0x11   :  { %v96_v3 = vld [vmem:[%s1397_s1 + $0x150] sm:$0xff]  ;;  %v97_v5 = vld [vmem:[%s1397_s1 + $0x158] sm:$0xff]  ;;  %v114_v8 = vld [vmem:[%s1397_s1 + $0x1e0] sm:$0xff]  ;;  %v733_v10 = vpack.c.bf16 %v65_v2, %v64_v1  ;;  %v735_v14 = vpack.c.bf16 %v83_v7, %v82_v6 }
  0x12   :  { %726 = vmatpush3.bf16.msra.mxu0 %v725_v50  ;;  %v115_v9 = vld [vmem:[%s1397_s1 + $0x1e8] sm:$0xff]  ;;  %v66_v11 = vld [vmem:[%s1397_s1 + $0x60] sm:$0xff]  ;;  %v765_v13 = vpack.c.bf16 %v97_v5, %v96_v3  ;;  %v17_v17 = vld [vmem:[%s1398_s0 + $0x18] sm:$0xff] }
  0x13   :  { %758 = vmatpush3.bf16.msra.mxu1 %v757_v51  ;;  %728 = vmatprep.subr.bf16.mxu0 %v727_v52  ;;  %v67_v12 = vld [vmem:[%s1397_s1 + $0x68] sm:$0xff]  ;;  %v98_v15 = vld [vmem:[%s1397_s1 + $0x160] sm:$0xff]  ;;  %v767_v18 = vpack.c.bf16 %v115_v9, %v114_v8  ;;  %v84_v20 = vld [vmem:[%s1397_s1 + $0xf0] sm:$0xff]  ;;  %v844_v51 = vmov 0.0|0.0  }
  0x14   :  { %760 = vmatprep.subr.bf16.mxu1 %v759_v56  ;;  %v15_v16 = vld [vmem:[%s1398_s0 + $0x8] sm:$0xff]  ;;  %v85_v21 = vld [vmem:[%s1397_s1 + $0xf8] sm:$0xff]  ;;  %v116_v22 = vld [vmem:[%s1397_s1 + $0x1f0] sm:$0xff]  ;;  %349 = vmatprep.mubr.f32.mxu1 %v17_v17  ;;  %v737_v24 = vpack.c.bf16 %v67_v12, %v66_v11 }
  0x15   :  { %v99_v19 = vld [vmem:[%s1397_s1 + $0x168] sm:$0xff]  ;;  %259 = vmatprep.mubr.f32.mxu0 %v15_v16  ;;  %v117_v23 = vld [vmem:[%s1397_s1 + $0x1f8] sm:$0xff]  ;;  %v739_v26 = vpack.c.bf16 %v85_v21, %v84_v20  ;;  %v68_v27 = vld [vmem:[%s1397_s1 + $0x70] sm:$0xff] }
  0x16   :  { %730 = vmatpush3.bf16.msra.mxu0 %v729_v62  ;;  %v769_v25 = vpack.c.bf16 %v99_v19, %v98_v15  ;;  %v69_v28 = vld [vmem:[%s1397_s1 + $0x78] sm:$0xff]  ;;  %v100_v29 = vld [vmem:[%s1397_s1 + $0x170] sm:$0xff]  ;;  %v771_v30 = vpack.c.bf16 %v117_v23, %v116_v22  ;;  %v134_v32 = vld [vmem:[%s1397_s1 + $0x280] sm:$0xff] }
  0x17   :  { %762 = vmatpush3.bf16.msra.mxu1 %v761_v63  ;;  %732 = vmatprep.subr.bf16.mxu0 %v731_v0  ;;  %v101_v31 = vld [vmem:[%s1397_s1 + $0x178] sm:$0xff]  ;;  %v135_v33 = vld [vmem:[%s1397_s1 + $0x288] sm:$0xff]  ;;  %v741_v34 = vpack.c.bf16 %v69_v28, %v68_v27  ;;  %v118_v37 = vld [vmem:[%s1397_s1 + $0x200] sm:$0xff] }
  0x18   :  { %764 = vmatprep.subr.bf16.mxu1 %v763_v4  ;;  %v773_v35 = vpack.c.bf16 %v101_v31, %v100_v29  ;;  %v775_v36 = vpack.c.bf16 %v135_v33, %v134_v32  ;;  %v119_v38 = vld [vmem:[%s1397_s1 + $0x208] sm:$0xff]  ;;  %v150_v39 = vld [vmem:[%s1397_s1 + $0x300] sm:$0xff]  ;;  %v136_v41 = vld [vmem:[%s1397_s1 + $0x290] sm:$0xff] }
  0x19   :  { %v151_v40 = vld [vmem:[%s1397_s1 + $0x308] sm:$0xff]  ;;  %v137_v42 = vld [vmem:[%s1397_s1 + $0x298] sm:$0xff]  ;;  %v14_v43 = vld [vmem:[%s1398_s0] sm:$0xff]  ;;  %v777_v45 = vpack.c.bf16 %v119_v38, %v118_v37 }
  0x1a   :  { %734 = vmatpush3.bf16.msra.mxu0 %v733_v10  ;;  %v16_v44 = vld [vmem:[%s1398_s0 + $0x10] sm:$0xff]  ;;  %v808_v46 = vpack.c.bf16 %v151_v40, %v150_v39  ;;  %v779_v47 = vpack.c.bf16 %v137_v42, %v136_v41  ;;  %v121_v49 = vld [vmem:[%s1397_s1 + $0x218] sm:$0xff]  ;;  %v138_v53 = vld [vmem:[%s1397_s1 + $0x2a0] sm:$0xff] }
  0x1b   :  { %766 = vmatpush3.bf16.msra.mxu1 %v765_v13  ;;  %736 = vmatprep.subr.bf16.mxu0 %v735_v14  ;;  %v120_v48 = vld [vmem:[%s1397_s1 + $0x210] sm:$0xff]  ;;  %v153_v52 = vld [vmem:[%s1397_s1 + $0x318] sm:$0xff]  ;;  %v139_v54 = vld [vmem:[%s1397_s1 + $0x2a8] sm:$0xff] }
  0x1c   :  { %768 = vmatprep.subr.bf16.mxu1 %v767_v18  ;;  %v152_v50 = vld [vmem:[%s1397_s1 + $0x310] sm:$0xff]  ;;  %v23_v55 = vld [vmem:[%s1398_s0 + $0x48] sm:$0xff]  ;;  %v781_v56 = vpack.c.bf16 %v121_v49, %v120_v48  ;;  %v122_v57 = vld [vmem:[%s1397_s1 + $0x220] sm:$0xff]  ;;  %v783_v60 = vpack.c.bf16 %v139_v54, %v138_v53 }
  0x1d   :  { %v22_v58 = vld [vmem:[%s1398_s0 + $0x40] sm:$0xff]  ;;  %v811_v59 = vpack.c.bf16 %v153_v52, %v152_v50  ;;  %v123_v61 = vld [vmem:[%s1397_s1 + $0x228] sm:$0xff]  ;;  %v140_v1 = vld [vmem:[%s1397_s1 + $0x2b0] sm:$0xff] }
  0x1e   :  { %738 = vmatpush3.bf16.msra.mxu0 %v737_v24  ;;  %v154_v62 = vld [vmem:[%s1397_s1 + $0x320] sm:$0xff]  ;;  %v31_v63 = vld [vmem:[%s1398_s0 + $0x88] sm:$0xff]  ;;  %v141_v2 = vld [vmem:[%s1397_s1 + $0x2b8] sm:$0xff]  ;;  %v785_v4 = vpack.c.bf16 %v123_v61, %v122_v57 }
  0x1f   :  { %770 = vmatpush3.bf16.msra.mxu1 %v769_v25  ;;  %740 = vmatprep.subr.bf16.mxu0 %v739_v26  ;;  %v155_v0 = vld [vmem:[%s1397_s1 + $0x328] sm:$0xff]  ;;  %v25_v3 = vld [vmem:[%s1398_s0 + $0x58] sm:$0xff]  ;;  %v124_v5 = vld [vmem:[%s1397_s1 + $0x230] sm:$0xff]  ;;  %v787_v9 = vpack.c.bf16 %v141_v2, %v140_v1 }
  0x20   :  { %772 = vmatprep.subr.bf16.mxu1 %v771_v30  ;;  %v30_v6 = vld [vmem:[%s1398_s0 + $0x80] sm:$0xff]  ;;  %v24_v7 = vld [vmem:[%s1398_s0 + $0x50] sm:$0xff]  ;;  %v814_v8 = vpack.c.bf16 %v155_v0, %v154_v62  ;;  %v125_v10 = vld [vmem:[%s1397_s1 + $0x238] sm:$0xff] }
  0x21   :  { %v156_v11 = vld [vmem:[%s1397_s1 + $0x330] sm:$0xff]  ;;  %v39_v12 = vld [vmem:[%s1398_s0 + $0xc8] sm:$0xff]  ;;  %v157_v13 = vld [vmem:[%s1397_s1 + $0x338] sm:$0xff]  ;;  %v789_v17 = vpack.c.bf16 %v125_v10, %v124_v5 }
  0x22   :  { %742 = vmatpush3.bf16.msra.mxu0 %v741_v34  ;;  %v142_v14 = vld [vmem:[%s1397_s1 + $0x2c0] sm:$0xff]  ;;  %v143_v15 = vld [vmem:[%s1397_s1 + $0x2c8] sm:$0xff]  ;;  %v33_v16 = vld [vmem:[%s1398_s0 + $0x98] sm:$0xff]  ;;  %v817_v21 = vpack.c.bf16 %v157_v13, %v156_v11 }
  0x23   :  { %774 = vmatpush3.bf16.msra.mxu1 %v773_v35  ;;  %776 = vmatprep.subr.bf16.mxu0 %v775_v36  ;;  %v126_v18 = vld [vmem:[%s1397_s1 + $0x240] sm:$0xff]  ;;  %v32_v20 = vld [vmem:[%s1398_s0 + $0x90] sm:$0xff]  ;;  %v791_v22 = vpack.c.bf16 %v143_v15, %v142_v14  ;;  %v127_v23 = vld [vmem:[%s1397_s1 + $0x248] sm:$0xff] }
  0x24   :  { %807 = vmatprep.subr.bf16.mxu1 %v844_v51  ;;  %v38_v19 = vld [vmem:[%s1398_s0 + $0xc0] sm:$0xff]  ;;  %v47_v25 = vld [vmem:[%s1398_s0 + $0x108] sm:$0xff]  ;;  %v144_v27 = vld [vmem:[%s1397_s1 + $0x2d0] sm:$0xff]  ;;  %v793_v30 = vpack.c.bf16 %v127_v23, %v126_v18 }
  0x25   :  { %260 = vmatmul.mubr.f32.vlgmr.msra.gmra.mrb[0].mxu0 %v14_v43  ;;  %v158_v24 = vld [vmem:[%s1397_s1 + $0x340] sm:$0xff]  ;;  %v159_v26 = vld [vmem:[%s1397_s1 + $0x348] sm:$0xff]  ;;  %v145_v28 = vld [vmem:[%s1397_s1 + $0x2d8] sm:$0xff] }
  0x26   :  { %350 = vmatmul.mubr.f32.vlgmr.msra.gmra.mrb[0].mxu1 %v16_v44  ;;  %778 = vmatpush3.bf16.msra.mxu0 %v777_v45  ;;  %v41_v29 = vld [vmem:[%s1398_s0 + $0xd8] sm:$0xff]  ;;  %v128_v31 = vld [vmem:[%s1397_s1 + $0x250] sm:$0xff]  ;;  %v46_v32 = vld [vmem:[%s1398_s0 + $0x100] sm:$0xff]  ;;  %v820_v34 = vpack.c.bf16 %v159_v26, %v158_v24  ;;  %v795_v35 = vpack.c.bf16 %v145_v28, %v144_v27 }
  0x27   :  { %809 = vmatpush1.bf16.msra.mxu1 %v808_v46  ;;  %780 = vmatprep.subr.bf16.mxu0 %v779_v47  ;;  %v40_v33 = vld [vmem:[%s1398_s0 + $0xd0] sm:$0xff]  ;;  %v129_v36 = vld [vmem:[%s1397_s1 + $0x258] sm:$0xff]  ;;  %v19_v38 = vld [vmem:[%s1398_s0 + $0x28] sm:$0xff] }
  0x28   :  { %810 = vmatprep.subr.bf16.mxu1 %v844_v51  ;;  %264 = vmatprep.mubr.f32.mxu0 %v23_v55  ;;  %v160_v37 = vld [vmem:[%s1397_s1 + $0x350] sm:$0xff]  ;;  %v161_v39 = vld [vmem:[%s1397_s1 + $0x358] sm:$0xff]  ;;  %v146_v40 = vld [vmem:[%s1397_s1 + $0x2e0] sm:$0xff]  ;;  %v797_v43 = vpack.c.bf16 %v129_v36, %v128_v31 }
  0x29   :  { %265 = vmatmul.mubr.f32.gmra.mrb[2].mxu0 %v22_v58  ;;  %354 = vmatprep.mubr.f32.mxu1 %v25_v3  ;;  %v147_v41 = vld [vmem:[%s1397_s1 + $0x2e8] sm:$0xff]  ;;  %v49_v42 = vld [vmem:[%s1398_s0 + $0x118] sm:$0xff]  ;;  %v130_v44 = vld [vmem:[%s1397_s1 + $0x260] sm:$0xff]  ;;  %v823_v46 = vpack.c.bf16 %v161_v39, %v160_v37 }
  0x2a   :  { %782 = vmatpush3.bf16.msra.mxu0 %v781_v56  ;;  %269 = vmatprep.mubr.f32.mxu0 %v31_v63  ;;  %v48_v45 = vld [vmem:[%s1398_s0 + $0x110] sm:$0xff]  ;;  %v799_v47 = vpack.c.bf16 %v147_v41, %v146_v40  ;;  %v131_v48 = vld [vmem:[%s1397_s1 + $0x268] sm:$0xff]  ;;  %v162_v49 = vld [vmem:[%s1397_s1 + $0x360] sm:$0xff] }
  0x2b   :  { %812 = vmatpush1.bf16.msra.mxu1 %v811_v59  ;;  %784 = vmatprep.subr.bf16.mxu0 %v783_v60  ;;  %v21_v50 = vld [vmem:[%s1398_s0 + $0x38] sm:$0xff]  ;;  %v163_v52 = vld [vmem:[%s1397_s1 + $0x368] sm:$0xff]  ;;  %v148_v53 = vld [vmem:[%s1397_s1 + $0x2f0] sm:$0xff]  ;;  %v801_v55 = vpack.c.bf16 %v131_v48, %v130_v44 }
  0x2c   :  { %813 = vmatprep.subr.bf16.mxu1 %v844_v51  ;;  %355 = vmatmul.mubr.f32.gmra.mrb[2].mxu1 %v24_v7  ;;  %v149_v54 = vld [vmem:[%s1397_s1 + $0x2f8] sm:$0xff]  ;;  %v826_v56 = vpack.c.bf16 %v163_v52, %v162_v49  ;;  %v132_v58 = vld [vmem:[%s1397_s1 + $0x270] sm:$0xff]  ;;  %v166_v0 = vld [vmem:[%s1397_s1 + $0x380] sm:$0xff] }
  0x2d   :  { %270 = vmatmul.mubr.f32.gmra.mrb[4].mxu0 %v30_v6  ;;  %359 = vmatprep.mubr.f32.mxu1 %v33_v16  ;;  %v803_v57 = vpack.c.bf16 %v149_v54, %v148_v53  ;;  %v133_v59 = vld [vmem:[%s1397_s1 + $0x278] sm:$0xff]  ;;  %v164_v60 = vld [vmem:[%s1397_s1 + $0x370] sm:$0xff]  ;;  %v167_v1 = vld [vmem:[%s1397_s1 + $0x388] sm:$0xff] }
  0x2e   :  { %786 = vmatpush3.bf16.msra.mxu0 %v785_v4  ;;  %274 = vmatprep.mubr.f32.mxu0 %v39_v12  ;;  %v165_v61 = vld [vmem:[%s1397_s1 + $0x378] sm:$0xff]  ;;  %v805_v62 = vpack.c.bf16 %v133_v59, %v132_v58  ;;  %v18_v2 = vld [vmem:[%s1398_s0 + $0x20] sm:$0xff]  ;;  %v832_v3 = vpack.c.bf16 %v167_v1, %v166_v0  ;;  %v27_v4 = vld [vmem:[%s1398_s0 + $0x68] sm:$0xff] }
  0x2f   :  { %815 = vmatpush1.bf16.msra.mxu1 %v814_v8  ;;  %788 = vmatprep.subr.bf16.mxu0 %v787_v9  ;;  %v829_v63 = vpack.c.bf16 %v165_v61, %v164_v60  ;;  %v168_v5 = vld [vmem:[%s1397_s1 + $0x390] sm:$0xff]  ;;  %v169_v6 = vld [vmem:[%s1397_s1 + $0x398] sm:$0xff]  ;;  %v26_v7 = vld [vmem:[%s1398_s0 + $0x60] sm:$0xff] }
  0x30   :  { %816 = vmatprep.subr.bf16.mxu1 %v844_v51  ;;  %360 = vmatmul.mubr.f32.gmra.mrb[4].mxu1 %v32_v20  ;;  %v835_v8 = vpack.c.bf16 %v169_v6, %v168_v5  ;;  %v35_v9 = vld [vmem:[%s1398_s0 + $0xa8] sm:$0xff]  ;;  %v170_v10 = vld [vmem:[%s1397_s1 + $0x3a0] sm:$0xff]  ;;  %v172_v15 = vld [vmem:[%s1397_s1 + $0x3b0] sm:$0xff] }
  0x31   :  { %275 = vmatmul.mubr.f32.gmra.mrb[6].mxu0 %v38_v19  ;;  %364 = vmatprep.mubr.f32.mxu1 %v41_v29  ;;  %v171_v11 = vld [vmem:[%s1397_s1 + $0x3a8] sm:$0xff]  ;;  %v34_v12 = vld [vmem:[%s1398_s0 + $0xa0] sm:$0xff]  ;;  %v173_v16 = vld [vmem:[%s1397_s1 + $0x3b8] sm:$0xff] }
  0x32   :  { %790 = vmatpush3.bf16.msra.mxu0 %v789_v17  ;;  %279 = vmatprep.mubr.f32.mxu0 %v47_v25  ;;  %v838_v13 = vpack.c.bf16 %v171_v11, %v170_v10  ;;  %v43_v14 = vld [vmem:[%s1398_s0 + $0xe8] sm:$0xff]  ;;  %v42_v17 = vld [vmem:[%s1398_s0 + $0xe0] sm:$0xff]  ;;  %v841_v18 = vpack.c.bf16 %v173_v16, %v172_v15  ;;  %v37_v23 = vld [vmem:[%s1398_s0 + $0xb8] sm:$0xff] }
  0x33   :  { %818 = vmatpush1.bf16.msra.mxu1 %v817_v21  ;;  %792 = vmatprep.subr.bf16.mxu0 %v791_v22  ;;  %v51_v19 = vld [vmem:[%s1398_s0 + $0x128] sm:$0xff]  ;;  %v50_v20 = vld [vmem:[%s1398_s0 + $0x120] sm:$0xff]  ;;  %v20_v21 = vld [vmem:[%s1398_s0 + $0x30] sm:$0xff] }
  0x34   :  { %819 = vmatprep.subr.bf16.mxu1 %v844_v51  ;;  %365 = vmatmul.mubr.f32.gmra.mrb[6].mxu1 %v40_v33  ;;  %v29_v22 = vld [vmem:[%s1398_s0 + $0x78] sm:$0xff]  ;;  %v36_v24 = vld [vmem:[%s1398_s0 + $0xb0] sm:$0xff]  ;;  %v174_v31 = vld [vmem:[%s1399_s2] sm:$0xff] }
  0x35   :  { %280 = vmatmul.mubr.f32.gmra.mrb[8].mxu0 %v46_v32  ;;  %369 = vmatprep.mubr.f32.mxu1 %v49_v42  ;;  %v45_v25 = vld [vmem:[%s1398_s0 + $0xf8] sm:$0xff]  ;;  %v44_v26 = vld [vmem:[%s1398_s0 + $0xf0] sm:$0xff]  ;;  %v178_v0 = vld [vmem:[%s1399_s2 + $0x20] sm:$0xff] }
  0x36   :  { %794 = vmatpush3.bf16.msra.mxu0 %v793_v30  ;;  %439 = vmatprep.mubr.f32.mxu0 %v19_v38  ;;  %v53_v27 = vld [vmem:[%s1398_s0 + $0x138] sm:$0xff]  ;;  %v52_v28 = vld [vmem:[%s1398_s0 + $0x130] sm:$0xff]  ;;  %v175_v38 = vld [vmem:[%s1399_s2 + $0x8] sm:$0xff] }
  0x37   :  { %821 = vmatpush1.bf16.msra.mxu1 %v820_v34  ;;  %796 = vmatprep.subr.bf16.mxu0 %v795_v35 }
  0x38   :  { %822 = vmatprep.subr.bf16.mxu1 %v844_v51  ;;  %370 = vmatmul.mubr.f32.gmra.mrb[8].mxu1 %v48_v45  ;;  %v176_v45 = vld [vmem:[%s1399_s2 + $0x10] sm:$0xff] }
  0x39   :  { %565 = vmatprep.mubr.msk.f32.mxu1 %vm179_vm0, %v21_v50 }
  0x3a   :  { %798 = vmatpush3.bf16.msra.mxu0 %v797_v43 }
  0x3b   :  { %824 = vmatpush1.bf16.msra.mxu1 %v823_v46  ;;  %800 = vmatprep.subr.bf16.mxu0 %v799_v47 }
  0x3c   :  { %825 = vmatprep.subr.bf16.mxu1 %v844_v51 }
  0x3e   :  { %802 = vmatpush3.bf16.msra.mxu0 %v801_v55  ;;  %v177_v55 = vld [vmem:[%s1399_s2 + $0x18] sm:$0xff] }
  0x3f   :  { %827 = vmatpush1.bf16.msra.mxu1 %v826_v56  ;;  %804 = vmatprep.subr.bf16.mxu0 %v803_v57 }
  0x40   :  { %828 = vmatprep.subr.bf16.mxu1 %v844_v51 }
  0x42   :  { %806 = vmatpush3.bf16.msra.mxu0 %v805_v62 }
  0x43   :  { %830 = vmatpush1.bf16.msra.mxu1 %v829_v63 }
  0x44   :  { %831 = vmatprep.subr.bf16.mxu1 %v844_v51 }
  0x45   :  { %440 = vmatmul.mubr.f32.vlgmr.msra.gmra.mrb[10].mxu0 %v18_v2 }
  0x46   :  { %444 = vmatprep.mubr.f32.mxu0 %v27_v4 }
  0x47   :  { %833 = vmatpush1.bf16.msra.mxu1 %v832_v3 }
  0x48   :  { %834 = vmatprep.subr.bf16.mxu1 %v844_v51 }
  0x49   :  { %445 = vmatmul.mubr.f32.gmra.mrb[12].mxu0 %v26_v7 }
  0x4a   :  { %449 = vmatprep.mubr.f32.mxu0 %v35_v9 }
  0x4b   :  { %836 = vmatpush1.bf16.msra.mxu1 %v835_v8 }
  0x4c   :  { %837 = vmatprep.subr.bf16.mxu1 %v844_v51 }
  0x4d   :  { %450 = vmatmul.mubr.f32.gmra.mrb[14].mxu0 %v34_v12 }
  0x4e   :  { %454 = vmatprep.mubr.f32.mxu0 %v43_v14 }
  0x4f   :  { %839 = vmatpush1.bf16.msra.mxu1 %v838_v13 }
  0x50   :  { %840 = vmatprep.subr.bf16.mxu1 %v844_v51  ;;  %v28_v51 = vld [vmem:[%s1398_s0 + $0x70] sm:$0xff] }
  0x51   :  { %455 = vmatmul.mubr.f32.gmra.mrb[16].mxu0 %v42_v17 }
  0x52   :  { %459 = vmatprep.mubr.f32.mxu0 %v51_v19 }
  0x53   :  { %842 = vmatpush1.bf16.msra.mxu1 %v841_v18 }
  0x55   :  { %460 = vmatmul.mubr.f32.gmra.mrb[18].mxu0 %v50_v20 }
  0x56   :  { %530 = vmatmul.mubr.f32.vlgmr.msra.gmra.mrb[10].mxu1 %v20_v21 }
  0x57   :  { %566 = vmatprep.mubr.msk.f32.mxu1 %vm179_vm0, %v29_v22 }
  0x5a   :  { %535 = vmatmul.mubr.f32.gmra.mrb[12].mxu1 %v28_v51 }
  0x5b   :  { %567 = vmatprep.mubr.msk.f32.mxu1 %vm179_vm0, %v37_v23 }
  0x5e   :  { %540 = vmatmul.mubr.f32.gmra.mrb[14].mxu1 %v36_v24 }
  0x5f   :  { %568 = vmatprep.mubr.msk.f32.mxu1 %vm179_vm0, %v45_v25 }
  0x62   :  { %545 = vmatmul.mubr.f32.gmra.mrb[16].mxu1 %v44_v26 }
  0x63   :  { %569 = vmatprep.mubr.msk.f32.mxu1 %vm179_vm0, %v53_v27 }
  0x66   :  { %550 = vmatmul.mubr.f32.gmra.mrb[18].mxu1 %v52_v28 }
  0xf8   :  { %v602_v29 = vpop.f32.mrb[0].mxu0 }
  0xf9   :  { %v649_v30 = vpop.f32.mrb[0].mxu1  ;;  %v603_v32 = vpop.f32.mrb[1].mxu0 }
  0xfa   :  { %v604_v33 = vadd.f32 %v603_v32, %v602_v29  ;;  %v650_v34 = vpop.f32.mrb[1].mxu1 }
  0xfb   :  { %v651_v35 = vadd.f32 %v650_v34, %v649_v30 }
  0xfc   :  { %v262_v36 = vadd.f32 %v604_v33, %v174_v31  ;;  %v605_v37 = vpop.f32.mrb[2].mxu0 }
  0xfd   :  { %v606_v39 = vpop.f32.mrb[3].mxu0 }
  0xfe   :  { %v352_v40 = vadd.f32 %v651_v35, %v262_v36  ;;  %v607_v41 = vadd.f32 %v606_v39, %v605_v37 }
  0xff   :  { %v652_v44 = vpop.f32.mrb[2].mxu1 }
 0x100   :  { %v267_v42 = vadd.f32 %v607_v41, %v175_v38  ;;  %v608_v43 = vpop.f32.mrb[4].mxu0  ;;  %v653_v47 = vpop.f32.mrb[3].mxu1 }
 0x101   :  { %v609_v46 = vpop.f32.mrb[5].mxu0  ;;  %v654_v49 = vadd.f32 %v653_v47, %v652_v44 }
 0x102   :  { %v610_v48 = vadd.f32 %v609_v46, %v608_v43 }
 0x103   :  { %v357_v53 = vadd.f32 %v654_v49, %v267_v42  ;;  %v655_v54 = vpop.f32.mrb[4].mxu1 }
 0x104   :  { %v272_v50 = vadd.f32 %v610_v48, %v176_v45  ;;  %v611_v52 = vpop.f32.mrb[6].mxu0  ;;  %v656_v57 = vpop.f32.mrb[5].mxu1 }
 0x105   :  { %v612_v56 = vpop.f32.mrb[7].mxu0  ;;  %v657_v59 = vadd.f32 %v656_v57, %v655_v54 }
 0x106   :  { %v613_v58 = vadd.f32 %v612_v56, %v611_v52 }
 0x107   :  { %v362_v62 = vadd.f32 %v657_v59, %v272_v50  ;;  %v658_v63 = vpop.f32.mrb[6].mxu1 }
 0x108   :  { %v277_v60 = vadd.f32 %v613_v58, %v177_v55  ;;  %v614_v61 = vpop.f32.mrb[8].mxu0  ;;  %v659_v2 = vpop.f32.mrb[7].mxu1 }
 0x109   :  { %v615_v1 = vpop.f32.mrb[9].mxu0  ;;  %v660_v4 = vadd.f32 %v659_v2, %v658_v63 }
 0x10a   :  { %v616_v3 = vadd.f32 %v615_v1, %v614_v61 }
 0x10b   :  { %v367_v6 = vadd.f32 %v660_v4, %v277_v60  ;;  %v661_v7 = vpop.f32.mrb[8].mxu1 }
 0x10c   :  { %v282_v5 = vadd.f32 %v616_v3, %v178_v0  ;;  %v662_v8 = vpop.f32.mrb[9].mxu1 }
 0x10d   :  { %v663_v9 = vadd.f32 %v662_v8, %v661_v7 }
 0x10f   :  { %v372_v10 = vadd.f32 %v663_v9, %v282_v5 }
 0x118   :  { %v696_v11 = vpop.f32.mrb[10].mxu0 }
 0x119   :  { %v697_v12 = vpop.f32.mrb[11].mxu0 }
 0x11a   :  { %v698_v13 = vadd.f32 %v697_v12, %v696_v11 }
 0x11c   :  { %v699_v14 = vpop.f32.mrb[12].mxu0  ;;  %v442_v15 = vadd.f32 %v698_v13, %v352_v40 }
 0x11d   :  { %v700_v16 = vpop.f32.mrb[13].mxu0 }
 0x11e   :  { %v701_v17 = vadd.f32 %v700_v16, %v699_v14 }
 0x120   :  { %v702_v18 = vpop.f32.mrb[14].mxu0  ;;  %v447_v19 = vadd.f32 %v701_v17, %v357_v53 }
 0x121   :  { %v703_v20 = vpop.f32.mrb[15].mxu0 }
 0x122   :  { %v704_v21 = vadd.f32 %v703_v20, %v702_v18 }
 0x124   :  { %v705_v22 = vpop.f32.mrb[16].mxu0  ;;  %v452_v51 = vadd.f32 %v704_v21, %v362_v62 }
 0x125   :  { %v706_v23 = vpop.f32.mrb[17].mxu0 }
 0x126   :  { %v707_v24 = vadd.f32 %v706_v23, %v705_v22 }
 0x128   :  { %v708_v25 = vpop.f32.mrb[18].mxu0  ;;  %v457_v26 = vadd.f32 %v707_v24, %v367_v6 }
 0x129   :  { %v531_v27 = vpop.f32.mrb[10].mxu1  ;;  %v709_v28 = vpop.f32.mrb[19].mxu0 }
 0x12a   :  { %v532_v29 = vadd.f32 %v531_v27, %v442_v15  ;;  %v710_v30 = vadd.f32 %v709_v28, %v708_v25  ;;  %v533_v31 = vpop.f32.mrb[11].mxu1 }
 0x12c   :  { %556 = vst.msk [vmem:[%s1400_s3] sm:$0xff] %vm555_vm1, %v532_v29  ;;  %v462_v32 = vadd.f32 %v710_v30, %v372_v10 }
 0x12d   :  { %v536_v33 = vpop.f32.mrb[12].mxu1 }
 0x12e   :  { %v537_v34 = vadd.f32 %v536_v33, %v447_v19  ;;  %v538_v35 = vpop.f32.mrb[13].mxu1 }
 0x130   :  { %557 = vst.msk [vmem:[%s1400_s3 + $0x8] sm:$0xff] %vm555_vm1, %v537_v34 }
 0x131   :  { %v541_v36 = vpop.f32.mrb[14].mxu1 }
 0x132   :  { %v542_v37 = vadd.f32 %v541_v36, %v452_v51  ;;  %v543_v38 = vpop.f32.mrb[15].mxu1 }
 0x134   :  { %558 = vst.msk [vmem:[%s1400_s3 + $0x10] sm:$0xff] %vm555_vm1, %v542_v37 }
 0x135   :  { %v546_v39 = vpop.f32.mrb[16].mxu1 }
 0x136   :  { %v547_v40 = vadd.f32 %v546_v39, %v457_v26  ;;  %v548_v41 = vpop.f32.mrb[17].mxu1 }
 0x138   :  { %559 = vst.msk [vmem:[%s1400_s3 + $0x18] sm:$0xff] %vm555_vm1, %v547_v40 }
 0x139   :  { %v551_v42 = vpop.f32.mrb[18].mxu1 }
 0x13a   :  { %v552_v43 = vadd.f32 %v551_v42, %v462_v32  ;;  %v553_v44 = vpop.f32.mrb[19].mxu1 }
 0x13c   :  { %560 = vst.msk [vmem:[%s1400_s3 + $0x20] sm:$0xff] %vm555_vm1, %v552_v43 }

</bundles_post_ra>
